<compile_context>
chip_gen: v6e
topology: v6e:2x2x1
jax: 0.10.0
libtpu: 0.0.40
codegen_flags: <defaults>
</compile_context>

<pallas_src>
import jax
import jax.numpy as jnp
from jax.experimental import pallas as pl
from jax.experimental.pallas import tpu as pltpu


def _query_punish_kernel(qg_ref, wt_ref, b_ref, vf_ref, score_ref):
    # qg_ref   : (TB, word_dim)             batch tile of question features
    # wt_ref   : (word_dim, module_dim)     pre-transposed linear weight (resident)
    # b_ref    : (1, module_dim)            linear bias (resident)
    # vf_ref   : (TB, num_clips, module_dim)
    # score_ref: (TB, num_clips)            sigmoid scores (broadcast done outside)

    # query = x @ W_t + b -> (TB, module_dim)   single MXU matmul, no transpose
    q = jnp.dot(qg_ref[...], wt_ref[...],
                preferred_element_type=jnp.float32) + b_ref[...]

    # Per-clip score <vf[b,c,:], q[b,:]> via VPU multiply + XLU lane reduce
    # (avoids an N=1 MXU matmul and the lane->sublane reshape of q).
    scores = jnp.sum(vf_ref[...] * q[:, None, :], axis=-1)       # (TB, num_clips)

    score_ref[...] = jax.nn.sigmoid(scores).astype(score_ref.dtype)


def _lane_pad(x):
    return ((x + 127) // 128) * 128


def _sub_pad(x):
    return ((x + 7) // 8) * 8


def _vmem_capacity_bytes():
    try:
        return int(pltpu.get_tpu_info().vmem_capacity_bytes)
    except Exception:
        return 64 << 20  # conservative default: v7x per-TensorCore VMEM


def _plan_tiling(B, word_dim, num_clips, module_dim):
    """Pick (batch_tile, padded_B, vmem_limit_bytes) from a VMEM byte budget."""
    itemsize = 4  # f32
    # Per-batch-row VMEM bytes (lane/sublane padded), counting:
    #   2x pipelined vf tile + 1 vf-tile-sized product intermediate,
    #   2x pipelined qg tile, 2x pipelined output tile.
    vf_row = _sub_pad(num_clips) * _lane_pad(module_dim) * itemsize
    qg_row = _lane_pad(word_dim) * itemsize
    out_row = _lane_pad(num_clips) * itemsize
    per_row = 3 * vf_row + 2 * qg_row + 2 * out_row
    # Resident (grid-invariant) weight + bias; count 2x in case single
    # buffering (pl.Buffered(1)) is unavailable and they get double-buffered.
    fixed = 2 * (_sub_pad(word_dim) * _lane_pad(module_dim)
                 + _sub_pad(1) * _lane_pad(module_dim)) * itemsize

    vmem_cap = _vmem_capacity_bytes()
    budget = min(int(vmem_cap * 0.6), 48 << 20)

    tb_max = max(8, ((budget - fixed) // per_row) // 8 * 8)
    tb_max = min(tb_max, 1024)  # diminishing returns past ~512-1024 rows/tile

    if B <= 8:
        # Tiny batch: one tile whose block dims equal the array dims (legal).
        tb, b_pad = B, B
    else:
        tb = tb_max
        if tb >= B and B >= 16:
            # Whole batch would be a single grid step: split so the grid has
            # >= 2 steps and "parallel" semantics can use both v7x TensorCores.
            tb = max(8, _sub_pad(pl.cdiv(B, 2)))
        tb = min(tb, _sub_pad(B))
        b_pad = pl.cdiv(B, tb) * tb

    est = fixed + tb * per_row
    vmem_limit = max(32 << 20, int(est * 1.5))
    vmem_limit = max(vmem_limit, est + (4 << 20))
    vmem_limit = min(vmem_limit, vmem_cap)
    return tb, b_pad, int(vmem_limit)


def _run_pallas(qg, wt, bias2d, vf, tb, b_pad, word_dim, num_clips, module_dim,
                vmem_limit, single_buffer_resident):
    if single_buffer_resident:
        def resident(shape):
            return pl.BlockSpec(shape, lambda b: (0,) * len(shape),
                                pipeline_mode=pl.Buffered(1))
    else:
        def resident(shape):
            return pl.BlockSpec(shape, lambda b: (0,) * len(shape))

    return pl.pallas_call(
        _query_punish_kernel,
        out_shape=jax.ShapeDtypeStruct((b_pad, num_clips), jnp.float32),
        grid_spec=pltpu.PrefetchScalarGridSpec(
            num_scalar_prefetch=0,
            grid=(b_pad // tb,),
            in_specs=[
                pl.BlockSpec((tb, word_dim), lambda b: (b, 0)),
                resident((word_dim, module_dim)),
                resident((1, module_dim)),
                pl.BlockSpec((tb, num_clips, module_dim), lambda b: (b, 0, 0)),
            ],
            out_specs=pl.BlockSpec((tb, num_clips), lambda b: (b, 0)),
        ),
        compiler_params=pltpu.CompilerParams(
            dimension_semantics=("parallel",),
            vmem_limit_bytes=vmem_limit),
    )(qg, wt, bias2d, vf)


def query_punish(question_guided, visual_feature, weight, bias):
    """Pallas-backed QueryPunish forward.

    question_guided: (B, word_dim) float32
    visual_feature : (B, num_clips, module_dim) float32
    weight         : (module_dim, word_dim) float32   (PyTorch nn.Linear layout)
    bias           : (module_dim,) float32
    returns        : (B, num_clips, module_dim // 4) float32
    """
    B, word_dim = question_guided.shape
    _, num_clips, module_dim = visual_feature.shape
    # PyTorch semantics: module_dim // 4 (module_dim < 4 would yield out_dim=0,
    # module_dim % 4 != 0 truncates — matches torch exactly).
    out_dim = module_dim // 4

    # Host-side, one-time layout fixes (free): transpose weight, 2-D bias.
    wt = weight.T.astype(jnp.float32)              # (word_dim, module_dim)
    bias2d = bias.reshape(1, module_dim).astype(jnp.float32)

    tb, b_pad, vmem_limit = _plan_tiling(B, word_dim, num_clips, module_dim)

    qg, vf = question_guided, visual_feature
    if b_pad != B:
        qg = jnp.pad(qg, ((0, b_pad - B), (0, 0)))
        vf = jnp.pad(vf, ((0, b_pad - B), (0, 0), (0, 0)))

    try:
        scores = _run_pallas(qg, wt, bias2d, vf, tb, b_pad, word_dim,
                             num_clips, module_dim, vmem_limit,
                             single_buffer_resident=True)
    except Exception:
        # pipeline_mode=pl.Buffered(1) unsupported on this JAX build: fall back
        # to default double-buffering of the resident weight/bias (minor cost).
        scores = _run_pallas(qg, wt, bias2d, vf, tb, b_pad, word_dim,
                             num_clips, module_dim, vmem_limit,
                             single_buffer_resident=False)

    scores = scores[:B]
    # Mirror PyTorch's non-materializing .expand(): lazy XLA broadcast outside
    # the kernel so the kernel writes out_dim x fewer bytes to HBM.
    return jnp.broadcast_to(scores[..., None], (B, num_clips, out_dim))


def _reference(question_guided, visual_feature, weight, bias):
    query = question_guided @ weight.T + bias                       # (B, module_dim)
    scores = jnp.einsum("bcd,bd->bc", visual_feature, query)        # (B, num_clips)
    scores = jax.nn.sigmoid(scores)[..., None]                      # (B, num_clips, 1)
    out_dim = visual_feature.shape[2] // 4
    return jnp.broadcast_to(scores, scores.shape[:2] + (out_dim,))


if __name__ == "__main__":
    # Small shapes consistent with the module (word_dim=32, module_dim=64)
    B, word_dim, module_dim, num_clips = 2, 32, 64, 8

    key = jax.random.PRNGKey(0)
    k_q, k_v, k_w, k_b = jax.random.split(key, 4)

    question_guided = jax.random.normal(k_q, (B, word_dim), dtype=jnp.float32)
    visual_feature = jax.random.normal(k_v, (B, num_clips, module_dim),
                                       dtype=jnp.float32)

    # Deterministic nn.Linear-style init: U(-1/sqrt(fan_in), 1/sqrt(fan_in))
    bound = 1.0 / jnp.sqrt(jnp.float32(word_dim))
    weight = jax.random.uniform(k_w, (module_dim, word_dim),
                                minval=-bound, maxval=bound, dtype=jnp.float32)
    bias = jax.random.uniform(k_b, (module_dim,),
                              minval=-bound, maxval=bound, dtype=jnp.float32)

    out = query_punish(question_guided, visual_feature, weight, bias)
    out = jax.block_until_ready(out)

    ref = _reference(question_guided, visual_feature, weight, bias)
    assert out.shape == (B, num_clips, module_dim // 4)
    assert jnp.allclose(out, ref, atol=1e-5, rtol=1e-5)

    print("KERNEL_OK")
</pallas_src>

<mosaic_0001>
module attributes {stable_mosaic.version = 11 : i64} {
  func.func @_query_punish_kernel(%arg0: i32, %arg1: memref<2x32xf32, #tpu.memory_space<vmem>>, %arg2: memref<32x64xf32, #tpu.memory_space<vmem>>, %arg3: memref<1x64xf32, #tpu.memory_space<vmem>>, %arg4: memref<2x8x64xf32, #tpu.memory_space<vmem>>, %arg5: memref<2x8xf32, #tpu.memory_space<vmem>>) attributes {dimension_semantics = [#tpu.dimension_semantics<parallel>], iteration_bounds = array<i64: 1>, scalar_prefetch = 0 : i64, scratch_operands = 0 : i64, tpu.core_type = #tpu.core_type<tc>, window_params = [{transform_indices = @transform_0, window_bounds = array<i64: 2, 32>}, {pipeline_mode = #tpu.pipeline_mode<synchronous>, transform_indices = @transform_1, window_bounds = array<i64: 32, 64>}, {pipeline_mode = #tpu.pipeline_mode<synchronous>, transform_indices = @transform_2, window_bounds = array<i64: 1, 64>}, {transform_indices = @transform_3, window_bounds = array<i64: 2, 8, 64>}, {transform_indices = @transform_4, window_bounds = array<i64: 2, 8>}]} {
    %c0 = arith.constant 0 : index
    %c0_0 = arith.constant 0 : index
    %0 = vector.load %arg1[%c0, %c0_0] : memref<2x32xf32, #tpu.memory_space<vmem>>, vector<2x32xf32>
    %c0_1 = arith.constant 0 : index
    %c0_2 = arith.constant 0 : index
    %1 = vector.load %arg2[%c0_1, %c0_2] : memref<32x64xf32, #tpu.memory_space<vmem>>, vector<32x64xf32>
    %cst = arith.constant dense<0.000000e+00> : vector<2x64xf32>
    %2 = tpu.matmul %0, %1, %cst {dimension_numbers = #tpu.dot_dimension_numbers<[1], [0], [0], [1], [0, 0, 1, 1], [], []>} : vector<2x32xf32>, vector<32x64xf32>, vector<2x64xf32> -> vector<2x64xf32>
    %c0_3 = arith.constant 0 : index
    %c0_4 = arith.constant 0 : index
    %3 = vector.load %arg3[%c0_3, %c0_4] : memref<1x64xf32, #tpu.memory_space<vmem>>, vector<1x64xf32>
    %4 = vector.broadcast %3 : vector<1x64xf32> to vector<2x64xf32>
    %5 = arith.addf %2, %4 : vector<2x64xf32>
    %c0_5 = arith.constant 0 : index
    %c0_6 = arith.constant 0 : index
    %c0_7 = arith.constant 0 : index
    %6 = vector.load %arg4[%c0_5, %c0_6, %c0_7] : memref<2x8x64xf32, #tpu.memory_space<vmem>>, vector<2x8x64xf32>
    %7 = vector.shape_cast %5 : vector<2x64xf32> to vector<2x1x64xf32>
    %8 = vector.broadcast %7 : vector<2x1x64xf32> to vector<2x8x64xf32>
    %9 = arith.mulf %6, %8 : vector<2x8x64xf32>
    %cst_8 = arith.constant dense<0.000000e+00> : vector<2x8xf32>
    %10 = vector.multi_reduction <add>, %9, %cst_8 [2] : vector<2x8x64xf32> to vector<2x8xf32>
    %11 = arith.negf %10 : vector<2x8xf32>
    %12 = math.exp %11 : vector<2x8xf32>
    %cst_9 = arith.constant 1.000000e+00 : f32
    %13 = vector.broadcast %cst_9 : f32 to vector<2x8xf32>
    %14 = arith.addf %13, %12 : vector<2x8xf32>
    %15 = arith.divf %13, %14 : vector<2x8xf32>
    %c0_10 = arith.constant 0 : index
    %c0_11 = arith.constant 0 : index
    %16 = vector.load %arg5[%c0_10, %c0_11] : memref<2x8xf32, #tpu.memory_space<vmem>>, vector<2x8xf32>
    tpu.vector_store %arg5[%c0_10, %c0_11], %15 {strides = array<i32>} : memref<2x8xf32, #tpu.memory_space<vmem>>, vector<2x8xf32>,
    return
  }
  func.func @transform_0(%arg0: i32) -> (i32, i32) {
    %c0_i32 = arith.constant 0 : i32
    %c0_i32_0 = arith.constant 0 : i32
    return %arg0, %c0_i32 : i32, i32
  }
  func.func @transform_1(%arg0: i32) -> (i32, i32) {
    %c0_i32 = arith.constant 0 : i32
    %c0_i32_0 = arith.constant 0 : i32
    %c0_i32_1 = arith.constant 0 : i32
    return %c0_i32, %c0_i32_0 : i32, i32
  }
  func.func @transform_2(%arg0: i32) -> (i32, i32) {
    %c0_i32 = arith.constant 0 : i32
    %c0_i32_0 = arith.constant 0 : i32
    %c0_i32_1 = arith.constant 0 : i32
    return %c0_i32, %c0_i32_0 : i32, i32
  }
  func.func @transform_3(%arg0: i32) -> (i32, i32, i32) {
    %c0_i32 = arith.constant 0 : i32
    %c0_i32_0 = arith.constant 0 : i32
    %c0_i32_1 = arith.constant 0 : i32
    return %arg0, %c0_i32, %c0_i32_0 : i32, i32, i32
  }
  func.func @transform_4(%arg0: i32) -> (i32, i32) {
    %c0_i32 = arith.constant 0 : i32
    %c0_i32_0 = arith.constant 0 : i32
    return %arg0, %c0_i32 : i32, i32
  }
}

module attributes {stable_mosaic.version = 11 : i64} {
  func.func @_query_punish_kernel(%arg0: i32, %arg1: memref<2x32xf32, #tpu.memory_space<vmem>>, %arg2: memref<32x64xf32, #tpu.memory_space<vmem>>, %arg3: memref<1x64xf32, #tpu.memory_space<vmem>>, %arg4: memref<2x8x64xf32, #tpu.memory_space<vmem>>, %arg5: memref<2x8xf32, #tpu.memory_space<vmem>>) attributes {dimension_semantics = [#tpu.dimension_semantics<parallel>], iteration_bounds = array<i64: 1>, scalar_prefetch = 0 : i64, scratch_operands = 0 : i64, tpu.core_type = #tpu.core_type<tc>, window_params = [{transform_indices = @transform_0, window_bounds = array<i64: 2, 32>}, {pipeline_mode = #tpu.pipeline_mode<synchronous>, transform_indices = @transform_1, window_bounds = array<i64: 32, 64>}, {pipeline_mode = #tpu.pipeline_mode<synchronous>, transform_indices = @transform_2, window_bounds = array<i64: 1, 64>}, {transform_indices = @transform_3, window_bounds = array<i64: 2, 8, 64>}, {transform_indices = @transform_4, window_bounds = array<i64: 2, 8>}]} {
    %c0 = arith.constant 0 : index
    %c0_0 = arith.constant 0 : index
    %0 = vector.load %arg1[%c0, %c0_0] : memref<2x32xf32, #tpu.memory_space<vmem>>, vector<2x32xf32>
    %c0_1 = arith.constant 0 : index
    %c0_2 = arith.constant 0 : index
    %1 = vector.load %arg2[%c0_1, %c0_2] : memref<32x64xf32, #tpu.memory_space<vmem>>, vector<32x64xf32>
    %cst = arith.constant dense<0.000000e+00> : vector<2x64xf32>
    %2 = tpu.matmul %0, %1, %cst {dimension_numbers = #tpu.dot_dimension_numbers<[1], [0], [0], [1], [0, 0, 1, 1], [], []>} : vector<2x32xf32>, vector<32x64xf32>, vector<2x64xf32> -> vector<2x64xf32>
    %c0_3 = arith.constant 0 : index
    %c0_4 = arith.constant 0 : index
    %3 = vector.load %arg3[%c0_3, %c0_4] : memref<1x64xf32, #tpu.memory_space<vmem>>, vector<1x64xf32>
    %4 = vector.broadcast %3 : vector<1x64xf32> to vector<2x64xf32>
    %5 = arith.addf %2, %4 : vector<2x64xf32>
    %c0_5 = arith.constant 0 : index
    %c0_6 = arith.constant 0 : index
    %c0_7 = arith.constant 0 : index
    %6 = vector.load %arg4[%c0_5, %c0_6, %c0_7] : memref<2x8x64xf32, #tpu.memory_space<vmem>>, vector<2x8x64xf32>
    %7 = vector.shape_cast %5 : vector<2x64xf32> to vector<2x1x64xf32>
    %8 = vector.broadcast %7 : vector<2x1x64xf32> to vector<2x8x64xf32>
    %9 = arith.mulf %6, %8 : vector<2x8x64xf32>
    %cst_8 = arith.constant dense<0.000000e+00> : vector<2x8xf32>
    %10 = vector.multi_reduction <add>, %9, %cst_8 [2] : vector<2x8x64xf32> to vector<2x8xf32>
    %11 = arith.negf %10 : vector<2x8xf32>
    %12 = math.exp %11 : vector<2x8xf32>
    %cst_9 = arith.constant 1.000000e+00 : f32
    %13 = vector.broadcast %cst_9 : f32 to vector<2x8xf32>
    %14 = arith.addf %13, %12 : vector<2x8xf32>
    %15 = arith.divf %13, %14 : vector<2x8xf32>
    %c0_10 = arith.constant 0 : index
    %c0_11 = arith.constant 0 : index
    %16 = vector.load %arg5[%c0_10, %c0_11] : memref<2x8xf32, #tpu.memory_space<vmem>>, vector<2x8xf32>
    tpu.vector_store %arg5[%c0_10, %c0_11], %15 {strides = array<i32>} : memref<2x8xf32, #tpu.memory_space<vmem>>, vector<2x8xf32>,
    return
  }
  func.func @transform_0(%arg0: i32) -> (i32, i32) {
    %c0_i32 = arith.constant 0 : i32
    %c0_i32_0 = arith.constant 0 : i32
    return %arg0, %c0_i32 : i32, i32
  }
  func.func @transform_1(%arg0: i32) -> (i32, i32) {
    %c0_i32 = arith.constant 0 : i32
    %c0_i32_0 = arith.constant 0 : i32
    %c0_i32_1 = arith.constant 0 : i32
    return %c0_i32, %c0_i32_0 : i32, i32
  }
  func.func @transform_2(%arg0: i32) -> (i32, i32) {
    %c0_i32 = arith.constant 0 : i32
    %c0_i32_0 = arith.constant 0 : i32
    %c0_i32_1 = arith.constant 0 : i32
    return %c0_i32, %c0_i32_0 : i32, i32
  }
  func.func @transform_3(%arg0: i32) -> (i32, i32, i32) {
    %c0_i32 = arith.constant 0 : i32
    %c0_i32_0 = arith.constant 0 : i32
    %c0_i32_1 = arith.constant 0 : i32
    return %arg0, %c0_i32, %c0_i32_0 : i32, i32, i32
  }
  func.func @transform_4(%arg0: i32) -> (i32, i32) {
    %c0_i32 = arith.constant 0 : i32
    %c0_i32_0 = arith.constant 0 : i32
    return %arg0, %c0_i32 : i32, i32
  }
}

</mosaic_0001>

<bundles_post_ra>
// kernel: tpu_custom_call.1
= control target key start
LH: loop header
LB: loop body
LE: loop exit
PB: predicated region body
PF: predicated region fallthrough
CT: control target
= control target key end

     0   :  { %9 = vsyncpa [#allocation3], 0  ;;  %s404_s0 = inlined_call_operand.hbm [shape: f32[2,32], index: 0, kind: input, shape index: {}]   ;;  %s405_s1 = inlined_call_operand.hbm [shape: f32[32,64], index: 1, kind: input, shape index: {}]   ;;  %s406_s2 = inlined_call_operand.vmem [shape: f32[1,64], index: 2, kind: input, shape index: {}]   ;;  %s407_s3 = inlined_call_operand.hbm [shape: f32[2,8,64], index: 3, kind: input, shape index: {}]   ;;  %s408_s4 = inlined_call_operand.hbm [shape: f32[2,8], index: 4, kind: output, shape index: {}]  }
   0x1   :  { %10 = vsyncpa [#allocation6], 0 }
   0x2   :  { %11 = vsyncpa [#allocation4], 0  ;;  %s355_s15 = smov [#allocation5]  }
   0x3   :  { %s27_s16 = sshll.u32 %s355_s15, 4  ;;  %s28_s16 = int_to_ptr.vmem [resolvable:$true] %s27_s16 }
   0x4   :  { %s277_s17 = scalar_lea.vmem %s28_s16, 512  ;;  %p282_p1 = scmp.lt.s32.totalorder %s28_s16, %s28_s16 }
   0x5   :  { %p278_p0 = scmp.ne.s32.totalorder %s28_s16, %s277_s17  ;;  %p283_p2 = scmp.lt.s32.totalorder %s277_s17, %s277_s17 }
   0x7   :  { %p284_p3 = por %p283_p2, %p282_p1 }
   0x9   :  { %p285_p4 = pnand %p284_p3, %p278_p0 }
   0xb   :  { %288 = shalt.err (!%p285_p4)
}
   0xc   :  { %s356_s18 = smov 128   ;;  %s357_s19 = smov 8  }
   0xd   :  { %33 = dma.hbm_to_vmem [thread:$0]  %s405_s1, 512, %s28_s16, [#allocation6], %s356_s18, %s356_s18, %s357_s19  }
   0xe   :  { %s358_s22 = smov [#allocation2]   ;;  %s359_s24 = smov [#allocation7]  }
   0xf   :  { %s18_s23 = sshll.u32 %s358_s22, 4  ;;  %s41_s25 = sshll.u32 %s359_s24, 4  ;;  %s19_s23 = int_to_ptr.vmem [resolvable:$true] %s18_s23  ;;  %s42_s25 = int_to_ptr.vmem [resolvable:$true] %s41_s25 }
  0x10   :  { %s297_s26 = scalar_lea.vmem %s19_s23, 32  ;;  %p302_p6 = scmp.lt.s32.totalorder %s19_s23, %s19_s23 }
  0x11   :  { %p298_p5 = scmp.ne.s32.totalorder %s19_s23, %s297_s26  ;;  %p303_p7 = scmp.lt.s32.totalorder %s297_s26, %s297_s26 }
  0x13   :  { %p304_p8 = por %p303_p7, %p302_p6 }
  0x15   :  { %p305_p9 = pnand %p304_p8, %p298_p5 }
  0x17   :  { %308 = shalt.err (!%p305_p9)
}
  0x18   :  { %21 = dma.hbm_to_vmem [thread:$0]  %s404_s0, 32, %s19_s23, [#allocation3]  }
  0x19   :  { %s317_s29 = scalar_lea.vmem %s42_s25, 256  ;;  %p322_p11 = scmp.lt.s32.totalorder %s42_s25, %s42_s25 }
  0x1a   :  { %p318_p10 = scmp.ne.s32.totalorder %s42_s25, %s317_s29  ;;  %p323_p12 = scmp.lt.s32.totalorder %s317_s29, %s317_s29 }
  0x1c   :  { %p324_p13 = por %p323_p12, %p322_p11 }
  0x1e   :  { %p325_p0 = pnand %p324_p13, %p318_p10 }
  0x20   :  { %328 = shalt.err (!%p325_p0)
}
  0x21   :  { %47 = dma.hbm_to_vmem [thread:$0]  %s407_s3, 256, %s42_s25, [#allocation6], %s356_s18, %s356_s18, %s357_s19  }
  0x22   :  { %349 = dma.done.wait [#allocation3], 32  }
  0x23   :  { %350 = vsyncadd [#allocation3], 4294967264 }
  0x24   :  { %351 = dma.done.wait [#allocation6], 768  }
  0x25   :  { %352 = vsyncadd [#allocation6], 4294966528  ;;  %v360_v0 = vmov 0.0   ;;  %vm361_vm0 = vmmov 0   ;;  %v61_v1 = vld [vmem:[#allocation5 + $0x18] sm:$0xff]  ;;  %v60_v2 = vld [vmem:[#allocation5 + $0x10] sm:$0xff]  ;;  %v149_v8 = vlaneseq }
  0x26   :  { %241 = vmatprep.subr.mxu0 %v360_v0  ;;  %249 = vmatprep.mubr.msk.f32.mxu0 %vm361_vm0, %v360_v0  ;;  %v59_v3 = vld [vmem:[#allocation5 + $0x8] sm:$0xff]  ;;  %v58_v4 = vld [vmem:[#allocation5] sm:$0xff]  ;;  %v57_v5 = vld [vmem:[#allocation2] sm:$0x3]  ;;  %vm69_vm1 = vcmask 261120   ;;  %vm180_vm2 = vcmask 523264  }
  0x27   :  { %242 = vmatpush3.msra.mxu0 %v61_v1  ;;  %v362_v6 = vmov 1966171168   ;;  %v150_v10 = vshrl.u32 %v149_v8, 7  ;;  %v232_v11 = vld [vmem:[%s406_s2] ss:$0 sm:$0xff]  ;;  %v143_v20 = vld [vmem:[#allocation7] sm:$0xff] }
  0x28   :  { %243 = vmatprep.subr.mxu0 %v360_v0  ;;  %v147_v7 = vunpack.c.l.s4 %v362_v6  ;;  %v144_v23 = vld [vmem:[#allocation7 + $0x8] sm:$0xff]  ;;  %v202_v37 = vand.u32 127, %v149_v8  ;;  %s363_s2 = smov [#allocation8]   ;;  %vm211_vm3 = vcmask 1041409   ;;  %vm214_vm4 = vcmask 58368  }
  0x29   :  { %244 = vmatpush3.msra.mxu0 %v60_v2  ;;  %v170_v17 = vsub.s32 0, %v150_v10  ;;  %s222_s5 = sshll.u32 %s363_s2, 4  ;;  %s223_s5 = int_to_ptr.vmem [resolvable:$true] %s222_s5 }
  0x2a   :  { %245 = vmatprep.subr.mxu0 %v360_v0  ;;  %v148_v9 = vunpack.c.0.s8 %v147_v7  ;;  %v205_v38 = vsub.s32 %v202_v37, %v150_v10  ;;  %s329_s6 = scalar_lea.vmem %s223_s5, 32  ;;  %p334_p2 = scmp.lt.s32.totalorder %s223_s5, %s223_s5 }
  0x2b   :  { %246 = vmatpush3.msra.mxu0 %v59_v3  ;;  %p330_p1 = scmp.ne.s32.totalorder %s223_s5, %s329_s6  ;;  %p335_p3 = scmp.lt.s32.totalorder %s329_s6, %s329_s6 }
  0x2c   :  { %247 = vmatprep.subr.mxu0 %v360_v0  ;;  %v151_v12 = vsub.s32 %v148_v9, %v150_v10 }
  0x2d   :  { %248 = vmatpush3.msra.mxu0 %v58_v4  ;;  %p336_p4 = por %p335_p3, %p334_p2 }
  0x2e   :  { %250 = vmatmul.mubr.msk.f32.vlgmr.msra.gmra.mxu0 %vm69_vm1, %v57_v5 }
  0x2f   :  { %p337_p5 = pnand %p336_p4, %p330_p1 }
  0xee   :  { %v139_v13 = vpop.f32.mrf.mxu0 }
  0xef   :  { %v140_v14 = vadd.f32 %v232_v11, %v139_v13 }
  0xf0   :  { %v251_v15 = vpop.f32.mrf.mxu0 }
  0xf1   :  { %v152_v16 = vrot.slane %v140_v14, %v151_v12 }
  0xf3   :  { %v153_v18 = vcombine.high %v152_v16, %v152_v16  ;;  %v160_v19 = vrot.slane %v152_v16, %v151_v12 }
  0xf5   :  { %v171_v21 = vrot.slane %v160_v19, %v170_v17  ;;  %v167_v22 = vrot.slane %v153_v18, %v151_v12 }
  0xf7   :  { %v178_v24 = vmul.f32 %v171_v21, %v143_v20  ;;  %v175_v25 = vrot.slane %v167_v22, %v170_v17 }
  0xf9   :  { %v181_v26 = vsel %vm180_vm2, %v178_v24, 0.0  ;;  %v179_v27 = vmul.f32 %v175_v25, %v144_v23 }
  0xfa   :  { %182 = vadd.xlane.f32.xlu0 %v181_v26 }
  0xfb   :  { %v184_v28 = vsel %vm180_vm2, %v179_v27, 0.0 }
  0xfe   :  { %185 = vadd.xlane.f32.xlu0 %v184_v28 }
 0x183   :  { %v183_v29 = vpop.xlane.xlu0 %182 }
 0x184   :  { %v234_v30 = vmul.f32 -1.442695, %v183_v29 }
 0x186   :  { %261 = vpow2.f32 %v234_v30 }
 0x187   :  { %v186_v31 = vpop.xlane.xlu0 %185 }
 0x188   :  { %v235_v32 = vmul.f32 -1.442695, %v186_v31 }
 0x18a   :  { %263 = vpow2.f32 %v235_v32 }
 0x193   :  { %v262_v33 = vpop.eup %261 }
 0x194   :  { %v193_v34 = vadd.f32 1.0, %v262_v33 }
 0x196   :  { %265 = vrcp.f32 %v193_v34 }
 0x197   :  { %v264_v35 = vpop.eup %263 }
 0x198   :  { %v194_v36 = vadd.f32 1.0, %v264_v35 }
 0x19a   :  { %267 = vrcp.f32 %v194_v36 }
 0x1a3   :  { %v266_v39 = vpop.eup %265 }
 0x1a4   :  { %v206_v41 = vrot.slane %v266_v39, %v205_v38 }
 0x1a7   :  { %v268_v40 = vpop.eup %267 }
 0x1a8   :  { %v210_v42 = vrot.slane %v268_v40, %v205_v38 }
 0x1aa   :  { %v212_v43 = vsel %vm211_vm3, %v210_v42, %v206_v41 }
 0x1ab   :  { %215 = vst.msk [vmem:[#allocation8] sm:$0x3] %vm214_vm4, %v212_v43 }
 0x1ac   :  { %340 = shalt.err (!%p337_p5)
}
 0x1ad   :  { %225 = dma.vmem_to_hbm [thread:$0]  %s223_s5, 32, %s408_s4, [#allocation4]  }
 0x1ae   :  { %353 = dma.done.wait [#allocation4], 32  }
 0x1af   :  { %354 = vsyncadd [#allocation4], 4294967264 }
 0x1b0   :  { %229 = vsyncpa [#allocation3], 1 }
 0x1b1   :  { %230 = vsyncpa [#allocation6], 1 }
 0x1b2   :  { %231 = vsyncpa [#allocation4], 1 }

// kernel: tpu_custom_call.1
= control target key start
LH: loop header
LB: loop body
LE: loop exit
PB: predicated region body
PF: predicated region fallthrough
CT: control target
= control target key end

     0   :  { %9 = vsyncpa [#allocation3], 0  ;;  %s404_s0 = inlined_call_operand.hbm [shape: f32[2,32], index: 0, kind: input, shape index: {}]   ;;  %s405_s1 = inlined_call_operand.hbm [shape: f32[32,64], index: 1, kind: input, shape index: {}]   ;;  %s406_s2 = inlined_call_operand.vmem [shape: f32[1,64], index: 2, kind: input, shape index: {}]   ;;  %s407_s3 = inlined_call_operand.hbm [shape: f32[2,8,64], index: 3, kind: input, shape index: {}]   ;;  %s408_s4 = inlined_call_operand.hbm [shape: f32[2,8], index: 4, kind: output, shape index: {}]  }
   0x1   :  { %10 = vsyncpa [#allocation6], 0 }
   0x2   :  { %11 = vsyncpa [#allocation4], 0  ;;  %s355_s15 = smov [#allocation5]  }
   0x3   :  { %s27_s16 = sshll.u32 %s355_s15, 4  ;;  %s28_s16 = int_to_ptr.vmem [resolvable:$true] %s27_s16 }
   0x4   :  { %s277_s17 = scalar_lea.vmem %s28_s16, 512  ;;  %p282_p1 = scmp.lt.s32.totalorder %s28_s16, %s28_s16 }
   0x5   :  { %p278_p0 = scmp.ne.s32.totalorder %s28_s16, %s277_s17  ;;  %p283_p2 = scmp.lt.s32.totalorder %s277_s17, %s277_s17 }
   0x7   :  { %p284_p3 = por %p283_p2, %p282_p1 }
   0x9   :  { %p285_p4 = pnand %p284_p3, %p278_p0 }
   0xb   :  { %288 = shalt.err (!%p285_p4)
}
   0xc   :  { %s356_s18 = smov 128   ;;  %s357_s19 = smov 8  }
   0xd   :  { %33 = dma.hbm_to_vmem [thread:$0]  %s405_s1, 512, %s28_s16, [#allocation6], %s356_s18, %s356_s18, %s357_s19  }
   0xe   :  { %s358_s22 = smov [#allocation2]   ;;  %s359_s24 = smov [#allocation7]  }
   0xf   :  { %s18_s23 = sshll.u32 %s358_s22, 4  ;;  %s41_s25 = sshll.u32 %s359_s24, 4  ;;  %s19_s23 = int_to_ptr.vmem [resolvable:$true] %s18_s23  ;;  %s42_s25 = int_to_ptr.vmem [resolvable:$true] %s41_s25 }
  0x10   :  { %s297_s26 = scalar_lea.vmem %s19_s23, 32  ;;  %p302_p6 = scmp.lt.s32.totalorder %s19_s23, %s19_s23 }
  0x11   :  { %p298_p5 = scmp.ne.s32.totalorder %s19_s23, %s297_s26  ;;  %p303_p7 = scmp.lt.s32.totalorder %s297_s26, %s297_s26 }
  0x13   :  { %p304_p8 = por %p303_p7, %p302_p6 }
  0x15   :  { %p305_p9 = pnand %p304_p8, %p298_p5 }
  0x17   :  { %308 = shalt.err (!%p305_p9)
}
  0x18   :  { %21 = dma.hbm_to_vmem [thread:$0]  %s404_s0, 32, %s19_s23, [#allocation3]  }
  0x19   :  { %s317_s29 = scalar_lea.vmem %s42_s25, 256  ;;  %p322_p11 = scmp.lt.s32.totalorder %s42_s25, %s42_s25 }
  0x1a   :  { %p318_p10 = scmp.ne.s32.totalorder %s42_s25, %s317_s29  ;;  %p323_p12 = scmp.lt.s32.totalorder %s317_s29, %s317_s29 }
  0x1c   :  { %p324_p13 = por %p323_p12, %p322_p11 }
  0x1e   :  { %p325_p0 = pnand %p324_p13, %p318_p10 }
  0x20   :  { %328 = shalt.err (!%p325_p0)
}
  0x21   :  { %47 = dma.hbm_to_vmem [thread:$0]  %s407_s3, 256, %s42_s25, [#allocation6], %s356_s18, %s356_s18, %s357_s19  }
  0x22   :  { %349 = dma.done.wait [#allocation3], 32  }
  0x23   :  { %350 = vsyncadd [#allocation3], 4294967264 }
  0x24   :  { %351 = dma.done.wait [#allocation6], 768  }
  0x25   :  { %352 = vsyncadd [#allocation6], 4294966528  ;;  %v360_v0 = vmov 0.0   ;;  %vm361_vm0 = vmmov 0   ;;  %v61_v1 = vld [vmem:[#allocation5 + $0x18] sm:$0xff]  ;;  %v60_v2 = vld [vmem:[#allocation5 + $0x10] sm:$0xff]  ;;  %v149_v8 = vlaneseq }
  0x26   :  { %241 = vmatprep.subr.mxu0 %v360_v0  ;;  %249 = vmatprep.mubr.msk.f32.mxu0 %vm361_vm0, %v360_v0  ;;  %v59_v3 = vld [vmem:[#allocation5 + $0x8] sm:$0xff]  ;;  %v58_v4 = vld [vmem:[#allocation5] sm:$0xff]  ;;  %v57_v5 = vld [vmem:[#allocation2] sm:$0x3]  ;;  %vm69_vm1 = vcmask 261120   ;;  %vm180_vm2 = vcmask 523264  }
  0x27   :  { %242 = vmatpush3.msra.mxu0 %v61_v1  ;;  %v362_v6 = vmov 1966171168   ;;  %v150_v10 = vshrl.u32 %v149_v8, 7  ;;  %v232_v11 = vld [vmem:[%s406_s2] ss:$0 sm:$0xff]  ;;  %v143_v20 = vld [vmem:[#allocation7] sm:$0xff] }
  0x28   :  { %243 = vmatprep.subr.mxu0 %v360_v0  ;;  %v147_v7 = vunpack.c.l.s4 %v362_v6  ;;  %v144_v23 = vld [vmem:[#allocation7 + $0x8] sm:$0xff]  ;;  %v202_v37 = vand.u32 127, %v149_v8  ;;  %s363_s2 = smov [#allocation8]   ;;  %vm211_vm3 = vcmask 1041409   ;;  %vm214_vm4 = vcmask 58368  }
  0x29   :  { %244 = vmatpush3.msra.mxu0 %v60_v2  ;;  %v170_v17 = vsub.s32 0, %v150_v10  ;;  %s222_s5 = sshll.u32 %s363_s2, 4  ;;  %s223_s5 = int_to_ptr.vmem [resolvable:$true] %s222_s5 }
  0x2a   :  { %245 = vmatprep.subr.mxu0 %v360_v0  ;;  %v148_v9 = vunpack.c.0.s8 %v147_v7  ;;  %v205_v38 = vsub.s32 %v202_v37, %v150_v10  ;;  %s329_s6 = scalar_lea.vmem %s223_s5, 32  ;;  %p334_p2 = scmp.lt.s32.totalorder %s223_s5, %s223_s5 }
  0x2b   :  { %246 = vmatpush3.msra.mxu0 %v59_v3  ;;  %p330_p1 = scmp.ne.s32.totalorder %s223_s5, %s329_s6  ;;  %p335_p3 = scmp.lt.s32.totalorder %s329_s6, %s329_s6 }
  0x2c   :  { %247 = vmatprep.subr.mxu0 %v360_v0  ;;  %v151_v12 = vsub.s32 %v148_v9, %v150_v10 }
  0x2d   :  { %248 = vmatpush3.msra.mxu0 %v58_v4  ;;  %p336_p4 = por %p335_p3, %p334_p2 }
  0x2e   :  { %250 = vmatmul.mubr.msk.f32.vlgmr.msra.gmra.mxu0 %vm69_vm1, %v57_v5 }
  0x2f   :  { %p337_p5 = pnand %p336_p4, %p330_p1 }
  0xee   :  { %v139_v13 = vpop.f32.mrf.mxu0 }
  0xef   :  { %v140_v14 = vadd.f32 %v232_v11, %v139_v13 }
  0xf0   :  { %v251_v15 = vpop.f32.mrf.mxu0 }
  0xf1   :  { %v152_v16 = vrot.slane %v140_v14, %v151_v12 }
  0xf3   :  { %v153_v18 = vcombine.high %v152_v16, %v152_v16  ;;  %v160_v19 = vrot.slane %v152_v16, %v151_v12 }
  0xf5   :  { %v171_v21 = vrot.slane %v160_v19, %v170_v17  ;;  %v167_v22 = vrot.slane %v153_v18, %v151_v12 }
  0xf7   :  { %v178_v24 = vmul.f32 %v171_v21, %v143_v20  ;;  %v175_v25 = vrot.slane %v167_v22, %v170_v17 }
  0xf9   :  { %v181_v26 = vsel %vm180_vm2, %v178_v24, 0.0  ;;  %v179_v27 = vmul.f32 %v175_v25, %v144_v23 }
  0xfa   :  { %182 = vadd.xlane.f32.xlu0 %v181_v26 }
  0xfb   :  { %v184_v28 = vsel %vm180_vm2, %v179_v27, 0.0 }
  0xfe   :  { %185 = vadd.xlane.f32.xlu0 %v184_v28 }
 0x183   :  { %v183_v29 = vpop.xlane.xlu0 %182 }
 0x184   :  { %v234_v30 = vmul.f32 -1.442695, %v183_v29 }
 0x186   :  { %261 = vpow2.f32 %v234_v30 }
 0x187   :  { %v186_v31 = vpop.xlane.xlu0 %185 }
 0x188   :  { %v235_v32 = vmul.f32 -1.442695, %v186_v31 }
 0x18a   :  { %263 = vpow2.f32 %v235_v32 }
 0x193   :  { %v262_v33 = vpop.eup %261 }
 0x194   :  { %v193_v34 = vadd.f32 1.0, %v262_v33 }
 0x196   :  { %265 = vrcp.f32 %v193_v34 }
 0x197   :  { %v264_v35 = vpop.eup %263 }
 0x198   :  { %v194_v36 = vadd.f32 1.0, %v264_v35 }
 0x19a   :  { %267 = vrcp.f32 %v194_v36 }
 0x1a3   :  { %v266_v39 = vpop.eup %265 }
 0x1a4   :  { %v206_v41 = vrot.slane %v266_v39, %v205_v38 }
 0x1a7   :  { %v268_v40 = vpop.eup %267 }
 0x1a8   :  { %v210_v42 = vrot.slane %v268_v40, %v205_v38 }
 0x1aa   :  { %v212_v43 = vsel %vm211_vm3, %v210_v42, %v206_v41 }
 0x1ab   :  { %215 = vst.msk [vmem:[#allocation8] sm:$0x3] %vm214_vm4, %v212_v43 }
 0x1ac   :  { %340 = shalt.err (!%p337_p5)
}
 0x1ad   :  { %225 = dma.vmem_to_hbm [thread:$0]  %s223_s5, 32, %s408_s4, [#allocation4]  }
 0x1ae   :  { %353 = dma.done.wait [#allocation4], 32  }
 0x1af   :  { %354 = vsyncadd [#allocation4], 4294967264 }
 0x1b0   :  { %229 = vsyncpa [#allocation3], 1 }
 0x1b1   :  { %230 = vsyncpa [#allocation6], 1 }
 0x1b2   :  { %231 = vsyncpa [#allocation4], 1 }

</bundles_post_ra>
